<compile_context>
chip_gen: v7x
topology: tpu7x:2x2x1
jax: 0.10.0
libtpu: 0.0.40
codegen_flags: <defaults>
</compile_context>

<pallas_src>
import jax
import jax.numpy as jnp
from jax import lax
from jax.experimental import pallas as pl
from jax.experimental.pallas import tpu as pltpu


def _round_up(n, m):
    return ((n + m - 1) // m) * m


def _vmem_limit_bytes(tile_e, img_dim_pad, two_r, b_pad):
    # double-buffered streamed blocks + resident blocks, with 1.5x headroom,
    # clamped to [32 MiB, 96 MiB] (v5e default scoped limit is only 16 MiB; v7x
    # physical VMEM is 64 MiB, but actual demand here stays far below the clamp).
    streamed = (tile_e * img_dim_pad * 2        # img tile (bf16)
                + tile_e * two_r * 4            # e0 tile (f32)
                + b_pad * tile_e * 4)           # output tile (f32)
    resident = (b_pad * img_dim_pad * 4         # qp (reassoc) / pm (fused), upper bound
                + b_pad * two_r * 4             # q
                + img_dim_pad * two_r * 4)      # post_mats
    est = 2 * streamed + resident
    return int(min(max(32 << 20, int(est * 1.5)), 96 << 20))


# ----------------------------------------------------------------------------
# Kernel (reassociated, small batch b_pad < 2*rank):
#   scores[:, tile] = q_scaled @ e0_tile^T + qp_scaled @ img_tile^T
#   with q_scaled = (1-a)*q (f32) and qp_scaled = a*(q @ pm^T) (bf16), both
#   precomputed once from only B rows outside the kernel.
# ----------------------------------------------------------------------------
def _score_reassoc_kernel(qp_ref, q_ref, img_ref, e0_ref, out_ref):
    s_img = lax.dot_general(                       # bf16 x bf16 -> f32 (MXU)
        qp_ref[...], img_ref[...],
        dimension_numbers=(((1,), (1,)), ((), ())),
        preferred_element_type=jnp.float32)
    s_e0 = lax.dot_general(                        # f32 NT dot, K = 2R (tiny)
        q_ref[...], e0_ref[...],
        dimension_numbers=(((1,), (1,)), ((), ())),
        preferred_element_type=jnp.float32)
    out_ref[...] = s_e0 + s_img


# ----------------------------------------------------------------------------
# Kernel (fused blend + score, b_pad >= 2*rank):
#   emb_tile = (1-a)*e0_tile + a*(img_tile_bf16 @ pm_bf16)   (stays in VMEM, f32)
#   scores[:, tile] = q @ emb_tile^T                          (NT dot_general)
# ----------------------------------------------------------------------------
def _score_fused_kernel(alpha_ref, q_ref, img_ref, pm_ref, e0_ref, out_ref):
    a = alpha_ref[0]                                           # SMEM scalar
    img_emb = jnp.dot(img_ref[...], pm_ref[...],               # bf16 x bf16 -> f32
                      preferred_element_type=jnp.float32)
    emb = (1.0 - a) * e0_ref[...] + a * img_emb                # (tile_e, 2R) f32
    out_ref[...] = lax.dot_general(
        q_ref[...], emb,
        dimension_numbers=(((1,), (1,)), ((), ())),            # NT contraction
        preferred_element_type=jnp.float32)


def _scores_reassoc(qp_bf16, q_scaled, img_bf16, e0_p, tile_e):
    b_pad, two_r = q_scaled.shape
    n_pad, img_dim_pad = img_bf16.shape
    limit = _vmem_limit_bytes(tile_e, img_dim_pad, two_r, b_pad)
    return pl.pallas_call(
        _score_reassoc_kernel,
        out_shape=jax.ShapeDtypeStruct((b_pad, n_pad), jnp.float32),
        grid=(n_pad // tile_e,),
        in_specs=[
            pl.BlockSpec((b_pad, img_dim_pad), lambda i: (0, 0)),   # qp (bf16), resident
            pl.BlockSpec((b_pad, two_r), lambda i: (0, 0)),         # q (f32), resident
            pl.BlockSpec((tile_e, img_dim_pad), lambda i: (i, 0)),  # img tile (bf16)
            pl.BlockSpec((tile_e, two_r), lambda i: (i, 0)),        # e0 tile (f32)
        ],
        out_specs=pl.BlockSpec((b_pad, tile_e), lambda i: (0, i)),  # lane-dense
        compiler_params=pltpu.CompilerParams(
            dimension_semantics=("parallel",), vmem_limit_bytes=limit),
    )(qp_bf16, q_scaled, img_bf16, e0_p)


def _scores_fused(alpha_arr, q, img_bf16, pm_bf16, e0_p, tile_e):
    b_pad, two_r = q.shape
    n_pad, img_dim_pad = img_bf16.shape
    limit = _vmem_limit_bytes(tile_e, img_dim_pad, two_r, b_pad)
    return pl.pallas_call(
        _score_fused_kernel,
        out_shape=jax.ShapeDtypeStruct((b_pad, n_pad), jnp.float32),
        grid=(n_pad // tile_e,),
        in_specs=[
            pl.BlockSpec(memory_space=pltpu.MemorySpace.SMEM),      # alpha scalar
            pl.BlockSpec((b_pad, two_r), lambda i: (0, 0)),         # q, resident
            pl.BlockSpec((tile_e, img_dim_pad), lambda i: (i, 0)),  # img tile (bf16)
            pl.BlockSpec((img_dim_pad, two_r), lambda i: (0, 0)),   # pm (bf16), resident
            pl.BlockSpec((tile_e, two_r), lambda i: (i, 0)),        # e0 tile (f32)
        ],
        out_specs=pl.BlockSpec((b_pad, tile_e), lambda i: (0, i)),  # lane-dense
        compiler_params=pltpu.CompilerParams(
            dimension_semantics=("parallel",), vmem_limit_bytes=limit),
    )(alpha_arr, q, img_bf16, pm_bf16, e0_p)


# ----------------------------------------------------------------------------
# Full forward (constant-alpha branch of ComplEx.forward)
# ----------------------------------------------------------------------------
def complex_forward(x, e0, e1, img_vec, post_mats, alpha, rank, *, tile_e=1024):
    n_ent, img_dim = img_vec.shape
    b = x.shape[0]
    two_r = 2 * rank

    # --- plain-JAX glue: data-dependent gathers + B-row query/factor math (f32) ---
    x = x.astype(jnp.int32)
    lhs_idx, rel_idx, rhs_idx = x[:, 0], x[:, 1], x[:, 2]
    lhs = (1.0 - alpha) * jnp.take(e0, lhs_idx, axis=0) + alpha * (
        jnp.take(img_vec, lhs_idx, axis=0) @ post_mats)
    rhs = (1.0 - alpha) * jnp.take(e0, rhs_idx, axis=0) + alpha * (
        jnp.take(img_vec, rhs_idx, axis=0) @ post_mats)
    rel = jnp.take(e1, rel_idx, axis=0)
    l0, l1 = lhs[:, :rank], lhs[:, rank:]
    r0, r1 = rel[:, :rank], rel[:, rank:]
    h0, h1 = rhs[:, :rank], rhs[:, rank:]
    q = jnp.concatenate([l0 * r0 - l1 * r1, l0 * r1 + l1 * r0], axis=1)
    factors = (jnp.sqrt(l0 * l0 + l1 * l1),
               jnp.sqrt(r0 * r0 + r1 * r1),
               jnp.sqrt(h0 * h0 + h1 * h1))

    # --- padding / tiling ---------------------------------------------------------
    b_pad = _round_up(max(b, 8), 8)                       # sublane multiple
    q_pad = jnp.zeros((b_pad, two_r), jnp.float32).at[:b].set(q.astype(jnp.float32))

    tile_e = max(128, _round_up(min(tile_e, n_ent), 128))  # lane-dense output columns
    n_pad128 = _round_up(n_ent, 128)
    if n_pad128 >= 256:                                    # >=2 tiles: keep v7x's 2nd TC busy
        tile_e = min(tile_e, _round_up((n_pad128 + 1) // 2, 128))
    n_pad = _round_up(n_ent, tile_e)

    img_dim_pad = _round_up(img_dim, 128)                  # 1000 -> 1024 in the real model
    img_p = jnp.pad(img_vec, ((0, n_pad - n_ent), (0, img_dim_pad - img_dim)))
    img_bf16 = img_p.astype(jnp.bfloat16)                  # halve the dominant HBM stream
    e0_p = jnp.pad(e0, ((0, n_pad - n_ent), (0, 0))).astype(jnp.float32)
    pm_p = jnp.pad(post_mats, ((0, img_dim_pad - img_dim), (0, 0))).astype(jnp.float32)

    if b_pad < two_r:
        # reassociated score (B-row prework only): drops the per-tile img@post_mats matmul
        qp = q_pad @ pm_p.T                                # (b_pad, img_dim_pad) f32
        scores = _scores_reassoc((alpha * qp).astype(jnp.bfloat16),
                                 (1.0 - alpha) * q_pad, img_bf16, e0_p, tile_e)
    else:
        scores = _scores_fused(jnp.asarray([alpha], jnp.float32), q_pad,
                               img_bf16, pm_p.astype(jnp.bfloat16), e0_p, tile_e)

    return scores[:b, :n_ent], factors


# ----------------------------------------------------------------------------
# Pure-JAX f32 reference (mirrors the torch code) for correctness checking
# ----------------------------------------------------------------------------
def complex_forward_ref(x, e0, e1, img_vec, post_mats, alpha, rank):
    img_emb = img_vec @ post_mats
    embedding = (1.0 - alpha) * e0 + alpha * img_emb
    lhs = embedding[x[:, 0]]
    rel = e1[x[:, 1]]
    rhs = embedding[x[:, 2]]
    l0, l1 = lhs[:, :rank], lhs[:, rank:]
    r0, r1 = rel[:, :rank], rel[:, rank:]
    h0, h1 = rhs[:, :rank], rhs[:, rank:]
    t0, t1 = embedding[:, :rank], embedding[:, rank:]
    scores = (l0 * r0 - l1 * r1) @ t0.T + (l0 * r1 + l1 * r0) @ t1.T
    return scores, (
        jnp.sqrt(l0**2 + l1**2),
        jnp.sqrt(r0**2 + r1**2),
        jnp.sqrt(h0**2 + h1**2),
    )


if __name__ == "__main__":
    # small, deterministic shapes consistent with the module
    N_ENT, N_REL = 512, 32         # sizes[0], sizes[1]
    RANK = 16                      # embedding width 2*RANK = 32
    IMG_DIM = 128                  # stand-in for img_dimension (=1000 in the module;
                                   # the wrapper pads this axis to a lane multiple)
    INIT_SIZE = 0.001
    ALPHA = 0.3                    # constant alpha (nn.Parameter, requires_grad=False)

    key = jax.random.PRNGKey(0)
    k_e0, k_e1, k_img, k_pm, k_x = jax.random.split(key, 5)

    # nn.Embedding default init ~ N(0,1), then scaled by init_size
    e0 = jax.random.normal(k_e0, (N_ENT, 2 * RANK), jnp.float32) * INIT_SIZE
    e1 = jax.random.normal(k_e1, (N_REL, 2 * RANK), jnp.float32) * INIT_SIZE
    # img_vec: loaded from pickle in the module; synthetic here
    img_vec = jax.random.normal(k_img, (N_ENT, IMG_DIM), jnp.float32)
    # post_mats: xavier_uniform(img_dim, 2*rank)
    bound = (6.0 / (IMG_DIM + 2 * RANK)) ** 0.5
    post_mats = jax.random.uniform(
        k_pm, (IMG_DIM, 2 * RANK), jnp.float32, minval=-bound, maxval=bound
    )

    def make_triples(kx, n):
        kx0, kx1, kx2 = jax.random.split(kx, 3)
        return jnp.stack(
            [jax.random.randint(kx0, (n,), 0, N_ENT),
             jax.random.randint(kx1, (n,), 0, N_REL),
             jax.random.randint(kx2, (n,), 0, N_ENT)],
            axis=1).astype(jnp.int32)

    k_small, k_large = jax.random.split(k_x)
    # B=8  < 2*rank  -> exercises the reassociated-score kernel
    # B=48 >= 2*rank -> exercises the fused blend+score kernel
    for bx in (make_triples(k_small, 8), make_triples(k_large, 48)):
        scores, factors = complex_forward(bx, e0, e1, img_vec, post_mats, ALPHA, RANK)
        jax.block_until_ready(scores)
        jax.block_until_ready(factors)

        ref_scores, ref_factors = complex_forward_ref(
            bx, e0, e1, img_vec, post_mats, ALPHA, RANK)
        assert scores.shape == ref_scores.shape
        # bf16 img stream (f32 accumulation) vs f32 reference -> loosened tolerance
        assert jnp.allclose(scores, ref_scores, atol=1e-4, rtol=2e-2), (
            float(jnp.max(jnp.abs(scores - ref_scores))))
        for got, ref in zip(factors, ref_factors):
            assert got.shape == ref.shape
            assert jnp.allclose(got, ref, atol=2e-5, rtol=1e-4)

    print("KERNEL_OK")
</pallas_src>

<mosaic_0001>
module attributes {stable_mosaic.version = 11 : i64} {
  func.func @_score_reassoc_kernel(%arg0: i32, %arg1: memref<8x128xbf16, #tpu.memory_space<vmem>>, %arg2: memref<8x32xf32, #tpu.memory_space<vmem>>, %arg3: memref<256x128xbf16, #tpu.memory_space<vmem>>, %arg4: memref<256x32xf32, #tpu.memory_space<vmem>>, %arg5: memref<8x256xf32, #tpu.memory_space<vmem>>) attributes {dimension_semantics = [#tpu.dimension_semantics<parallel>], iteration_bounds = array<i64: 2>, scalar_prefetch = 0 : i64, scratch_operands = 0 : i64, tpu.core_type = #tpu.core_type<tc>, window_params = [{pipeline_mode = #tpu.pipeline_mode<synchronous>, transform_indices = @transform_0, window_bounds = array<i64: 8, 128>}, {pipeline_mode = #tpu.pipeline_mode<synchronous>, transform_indices = @transform_1, window_bounds = array<i64: 8, 32>}, {transform_indices = @transform_2, window_bounds = array<i64: 256, 128>}, {transform_indices = @transform_3, window_bounds = array<i64: 256, 32>}, {transform_indices = @transform_4, window_bounds = array<i64: 8, 256>}]} {
    %c0 = arith.constant 0 : index
    %c0_0 = arith.constant 0 : index
    %0 = vector.load %arg1[%c0, %c0_0] : memref<8x128xbf16, #tpu.memory_space<vmem>>, vector<8x128xbf16>
    %c0_1 = arith.constant 0 : index
    %c0_2 = arith.constant 0 : index
    %1 = vector.load %arg3[%c0_1, %c0_2] : memref<256x128xbf16, #tpu.memory_space<vmem>>, vector<256x128xbf16>
    %cst = arith.constant dense<0.000000e+00> : vector<8x256xf32>
    %2 = tpu.matmul %0, %1, %cst {dimension_numbers = #tpu.dot_dimension_numbers<[1], [1], [0], [0], [0, 0, 1, 0], [], []>} : vector<8x128xbf16>, vector<256x128xbf16>, vector<8x256xf32> -> vector<8x256xf32>
    %c0_3 = arith.constant 0 : index
    %c0_4 = arith.constant 0 : index
    %3 = vector.load %arg2[%c0_3, %c0_4] : memref<8x32xf32, #tpu.memory_space<vmem>>, vector<8x32xf32>
    %c0_5 = arith.constant 0 : index
    %c0_6 = arith.constant 0 : index
    %4 = vector.load %arg4[%c0_5, %c0_6] : memref<256x32xf32, #tpu.memory_space<vmem>>, vector<256x32xf32>
    %cst_7 = arith.constant dense<0.000000e+00> : vector<8x256xf32>
    %5 = tpu.matmul %3, %4, %cst_7 {dimension_numbers = #tpu.dot_dimension_numbers<[1], [1], [0], [0], [0, 0, 1, 0], [], []>} : vector<8x32xf32>, vector<256x32xf32>, vector<8x256xf32> -> vector<8x256xf32>
    %6 = arith.addf %5, %2 : vector<8x256xf32>
    %c0_8 = arith.constant 0 : index
    %c0_9 = arith.constant 0 : index
    %7 = vector.load %arg5[%c0_8, %c0_9] : memref<8x256xf32, #tpu.memory_space<vmem>>, vector<8x256xf32>
    tpu.vector_store %arg5[%c0_8, %c0_9], %6 {strides = array<i32>} : memref<8x256xf32, #tpu.memory_space<vmem>>, vector<8x256xf32>,
    return
  }
  func.func @transform_0(%arg0: i32) -> (i32, i32) {
    %c0_i32 = arith.constant 0 : i32
    %c0_i32_0 = arith.constant 0 : i32
    %c0_i32_1 = arith.constant 0 : i32
    return %c0_i32, %c0_i32_0 : i32, i32
  }
  func.func @transform_1(%arg0: i32) -> (i32, i32) {
    %c0_i32 = arith.constant 0 : i32
    %c0_i32_0 = arith.constant 0 : i32
    %c0_i32_1 = arith.constant 0 : i32
    return %c0_i32, %c0_i32_0 : i32, i32
  }
  func.func @transform_2(%arg0: i32) -> (i32, i32) {
    %c0_i32 = arith.constant 0 : i32
    %c0_i32_0 = arith.constant 0 : i32
    return %arg0, %c0_i32 : i32, i32
  }
  func.func @transform_3(%arg0: i32) -> (i32, i32) {
    %c0_i32 = arith.constant 0 : i32
    %c0_i32_0 = arith.constant 0 : i32
    return %arg0, %c0_i32 : i32, i32
  }
  func.func @transform_4(%arg0: i32) -> (i32, i32) {
    %c0_i32 = arith.constant 0 : i32
    %c0_i32_0 = arith.constant 0 : i32
    return %c0_i32, %arg0 : i32, i32
  }
}

</mosaic_0001>

<bundles_post_ra>
// kernel: tpu_custom_call.1
= control target key start
LH: loop header
LB: loop body
LE: loop exit
PB: predicated region body
PF: predicated region fallthrough
CT: control target
= control target key end

     0   :  { %9 = vsyncpa [#allocation3], 0  ;;  %s1201_s0 = inlined_call_operand.vmem [shape: bf16[8,128], index: 0, kind: input, shape index: {}]   ;;  %s1202_s1 = inlined_call_operand.vmem [shape: f32[8,32], index: 1, kind: input, shape index: {}]   ;;  %s1203_s2 = inlined_call_operand.vmem [shape: bf16[512,128], index: 2, kind: input, shape index: {}]   ;;  %s1204_s3 = inlined_call_operand.vmem [shape: f32[512,32], index: 3, kind: input, shape index: {}]   ;;  %s1205_s4 = inlined_call_operand.hbm [shape: f32[8,512], index: 4, kind: output, shape index: {}]  }
   0x1   :  { %11 = vsyncpa [#allocation3 + $0x1], 0  ;;  %s993_s15 = smov 0   ;;  %s995_s16 = smov 0  }
   0x2   :  { %s997_s17 = smov 0   ;;  %s999_s18 = smov 0  }
   0x3 LB: > { %s1014_s19 = sadd.s32 4294967295, %s965_s18   ;;  %s684_s20 = sadd.s32 4294967294, %s965_s18   ;;  %s965_s18 = sphi %s999_s18, %s1213_s18   ;;  %s961_s17 = sphi %s997_s17, %s1212_s17   ;;  %s957_s16 = sphi %s995_s16, %s1211_s16   ;;  %s953_s15 = sphi %s993_s15, %s1210_s15  }
   0x4   : > { %s1018_s21 = sadd.s32 1, %s965_s18   ;;  %s118_s22 = sadd.s32 1, %s961_s17 }
   0x5   : > { %s115_s23 = ssub.s32 %s965_s18, %s1018_s21  ;;  %p128_p0 = scmp.ne.s32.totalorder %s961_s17, %s957_s16 }
   0x6   : > { %p116_p1 = scmp.eq.s32.totalorder %s115_s23, 0  ;;  %p129_p2 = scmp.eq.s32.totalorder %s1014_s19, 1 }
   0x7   : > { %p134_p3 = scmp.ne.s32.totalorder %s957_s16, %s953_s15  ;;  %p135_p4 = scmp.eq.s32.totalorder %s684_s20, 1 }
   0x8   : > { %s1029_s24 = scalar_select %p116_p1, %s961_s17, %s118_s22  }
   0x9   : > { %p1031_p5 = por %p129_p2, %p128_p0  ;;  %p1035_p6 = por %p135_p4, %p134_p3 }
   0xa   : > { %p687_p7 = scmp.ge.s32.totalorder %s965_s18, 1  ;;  %p177_p8 = scmp.lt.s32.totalorder %s965_s18, 3 }
   0xc   : > { %p178_p9 = pnand %p687_p7, %p177_p8 }
   0xd   : > { %s689_s27 = sshll.u32 (!%p178_p9), %s1014_s19, 5  ;;  %vm425_vm0 = vcmask (!%p178_p9), 261120   ;;  %v1045_v0 = vld [vmem:[%s1201_s0] sm:$0xf] (!%p178_p9)  ;;  %s205_s14 = sand.u32 (!%p178_p9), 1, %s957_s16  }
   0xe   : > { %181 = sbr.rel (%p178_p9) target bundleno = 322 (0x142), region = 36  ;;  %v1050_v1 = vld [vmem:[%s1202_s1] sm:$0xff] (!%p178_p9)  ;;  %p209_p10 = scmp.lt.s32.totalorder (!%p178_p9), %s689_s27, 63  ;;  %764 = vmatprep.mubr.bf16.mxu0 (!%p178_p9), %v1045_v0  ;;  %vm1067_vm1 = vmpackc.low (!%p178_p9), %vm425_vm0, %vm425_vm0 }
   0xf   : > { %798 = vmatprep.mubr.msk.f32.mxu1 (!%p178_p9), %vm425_vm0, %v1050_v1  ;;  %s688_s20 = sshll.u32 (!%p178_p9), %s205_s14, 4  ;;  %s747_s22 = sshll.u32 (!%p178_p9), %s1014_s19, 8 }
  0x10   : > { %s207_s23 = scalar_lea.vmem (!%p178_p9), [#allocation2], %s688_s20  ;;  %s1159_s30 = scalar_lea.hbm (!%p178_p9), %s1205_s4, %s747_s22 }
  0x11   : > { %s599_s19 = scalar_lea.sflag (!%p178_p9), [#allocation3], %s205_s14 }
  0x15   : > { %s1215_s27 = smov (!%p209_p10, %s689_s27), 63 }
  0x16   : > { %s690_s6 = sshll.u32 %s1215_s27, 2  ;;  %s692_s7 = sshll.u32 %s1215_s27, 3 }
  0x17   : > { %s1058_s10 = scalar_lea.vmem %s1203_s2, %s690_s6  ;;  %s1063_s13 = scalar_lea.vmem %s1204_s3, %s692_s7 }
  0x18   : > { %v887_v3 = vld [vmem:[%s1058_s10 + $0x40] sm:$0xff]   ;;  %v410_v5 = vld [vmem:[%s1063_s13 + $0x88] sm:$0xff]  ;;  %v411_v12 = vld [vmem:[%s1063_s13 + $0x90] sm:$0xff]  ;;  %s613_s27 = sshll.u32 %s207_s23, 4  ;;  %s967_s6 = smov [#allocation2]   ;;  %s1161_s27 = int_to_ptr.vmem [resolvable:$true] %s613_s27 }
  0x19   : > { %v409_v4 = vld [vmem:[%s1063_s13 + $0x80] sm:$0xff]  ;;  %748 = vmatprep.subr.bf16.mxu0 %v887_v3  ;;  %v394_v9 = vld [vmem:[%s1063_s13 + $0x8] sm:$0xff]  ;;  %v412_v13 = vld [vmem:[%s1063_s13 + $0x98] sm:$0xff]  ;;  %s903_s5 = scalar_lea.vmem %s1161_s27, 256  ;;  %s907_s7 = sshll.u32 %s967_s6, 4  ;;  %s908_s7 = int_to_ptr.vmem [resolvable:$false] %s907_s7 }
  0x1a   : > { %v800_v6 = vpack.c.bf16 %v410_v5, %v409_v4  ;;  %v888_v7 = vld [vmem:[%s1058_s10] sm:$0xff]   ;;  %v889_v11 = vld [vmem:[%s1058_s10 + $0x48] sm:$0xff]   ;;  %v806_v14 = vpack.c.bf16 %v412_v13, %v411_v12  ;;  %v395_v16 = vld [vmem:[%s1063_s13 + $0x10] sm:$0xff]  ;;  %p904_p11 = scmp.ne.s32.totalorder %s1161_s27, %s903_s5  ;;  %s909_s8 = scalar_lea.vmem %s908_s7, 512 }
  0x1b   : > { %v393_v8 = vld [vmem:[%s1063_s13] sm:$0xff]  ;;  %749 = vmatpush3.bf16.xpose.msra.mxu0 %v888_v7  ;;  %v890_v15 = vld [vmem:[%s1058_s10 + $0x8] sm:$0xff]   ;;  %v396_v17 = vld [vmem:[%s1063_s13 + $0x18] sm:$0xff]  ;;  %p910_p0 = scmp.lt.s32.totalorder %s1161_s27, %s908_s7  ;;  %p911_p1 = scmp.lt.s32.totalorder %s909_s8, %s903_s5 }
  0x1c   : > { %802 = vmatprep.subr.msk.bf16.mxu1 %vm1067_vm1, %v800_v6  ;;  %v803_v10 = vpack.c.bf16 %v394_v9, %v393_v8  ;;  %750 = vmatprep.subr.bf16.mxu0 %v889_v11  ;;  %v413_v18 = vld [vmem:[%s1063_s13 + $0xa0] sm:$0xff]  ;;  %v414_v19 = vld [vmem:[%s1063_s13 + $0xa8] sm:$0xff]  ;;  %v891_v20 = vld [vmem:[%s1058_s10 + $0x50] sm:$0xff]   ;;  %v809_v21 = vpack.c.bf16 %v396_v17, %v395_v16  ;;  %p905_p12 = pnand %p904_p11, %p1031_p5 }
  0x1d   : > { %v812_v22 = vpack.c.bf16 %v414_v19, %v413_v18  ;;  %v892_v23 = vld [vmem:[%s1058_s10 + $0x10] sm:$0xff]   ;;  %v397_v24 = vld [vmem:[%s1063_s13 + $0x20] sm:$0xff]  ;;  %v398_v25 = vld [vmem:[%s1063_s13 + $0x28] sm:$0xff]  ;;  %p912_p2 = por %p911_p1, %p910_p0 }
  0x1e   : > { %805 = vmatpush3.bf16.xpose.msk.msra.mxu1 %vm1067_vm1, %v803_v10  ;;  %v415_v26 = vld [vmem:[%s1063_s13 + $0xb0] sm:$0xff]  ;;  %v416_v27 = vld [vmem:[%s1063_s13 + $0xb8] sm:$0xff]  ;;  %v815_v29 = vpack.c.bf16 %v398_v25, %v397_v24  ;;  %v417_v34 = vld [vmem:[%s1063_s13 + $0xc0] sm:$0xff]  ;;  %p906_p13 = pneg %p905_p12 }
  0x1f   : > { %808 = vmatprep.subr.msk.bf16.mxu1 %vm1067_vm1, %v806_v14  ;;  %v893_v28 = vld [vmem:[%s1058_s10 + $0x58] sm:$0xff]   ;;  %v818_v30 = vpack.c.bf16 %v416_v27, %v415_v26  ;;  %v399_v31 = vld [vmem:[%s1063_s13 + $0x30] sm:$0xff]  ;;  %v418_v35 = vld [vmem:[%s1063_s13 + $0xc8] sm:$0xff] }
  0x20   : > { %v400_v32 = vld [vmem:[%s1063_s13 + $0x38] sm:$0xff]  ;;  %v895_v36 = vld [vmem:[%s1058_s10 + $0x60] sm:$0xff]   ;;  %v824_v38 = vpack.c.bf16 %v418_v35, %v417_v34  ;;  %v402_v40 = vld [vmem:[%s1063_s13 + $0x48] sm:$0xff]  ;;  %p913_p3 = pnand %p912_p2, %p906_p13 }
  0x21   : > { %v894_v33 = vld [vmem:[%s1058_s10 + $0x18] sm:$0xff]   ;;  %v821_v37 = vpack.c.bf16 %v400_v32, %v399_v31  ;;  %v401_v39 = vld [vmem:[%s1063_s13 + $0x40] sm:$0xff]  ;;  %v419_v42 = vld [vmem:[%s1063_s13 + $0xd0] sm:$0xff] }
  0x22   : > { %v896_v41 = vld [vmem:[%s1058_s10 + $0x20] sm:$0xff]   ;;  %v420_v43 = vld [vmem:[%s1063_s13 + $0xd8] sm:$0xff]  ;;  %v897_v44 = vld [vmem:[%s1058_s10 + $0x68] sm:$0xff]   ;;  %v827_v45 = vpack.c.bf16 %v402_v40, %v401_v39 }
  0x23   : > { %751 = vmatpush3.bf16.xpose.msra.mxu0 %v890_v15  ;;  %v830_v46 = vpack.c.bf16 %v420_v43, %v419_v42  ;;  %v403_v47 = vld [vmem:[%s1063_s13 + $0x50] sm:$0xff]  ;;  %v404_v48 = vld [vmem:[%s1063_s13 + $0x58] sm:$0xff]  ;;  %v898_v49 = vld [vmem:[%s1058_s10 + $0x28] sm:$0xff]  }
  0x24   : > { %752 = vmatprep.subr.bf16.mxu0 %v891_v20  ;;  %v421_v50 = vld [vmem:[%s1063_s13 + $0xe0] sm:$0xff]  ;;  %v422_v51 = vld [vmem:[%s1063_s13 + $0xe8] sm:$0xff]  ;;  %v899_v52 = vld [vmem:[%s1058_s10 + $0x70] sm:$0xff]   ;;  %v833_v53 = vpack.c.bf16 %v404_v48, %v403_v47 }
  0x25   : > { %v836_v54 = vpack.c.bf16 %v422_v51, %v421_v50  ;;  %v405_v55 = vld [vmem:[%s1063_s13 + $0x60] sm:$0xff]  ;;  %v406_v56 = vld [vmem:[%s1063_s13 + $0x68] sm:$0xff]  ;;  %v900_v57 = vld [vmem:[%s1058_s10 + $0x30] sm:$0xff]  }
  0x26   : > { %811 = vmatpush3.bf16.xpose.msk.msra.mxu1 %vm1067_vm1, %v809_v21  ;;  %v423_v58 = vld [vmem:[%s1063_s13 + $0xf0] sm:$0xff]  ;;  %v424_v59 = vld [vmem:[%s1063_s13 + $0xf8] sm:$0xff]  ;;  %v839_v61 = vpack.c.bf16 %v406_v56, %v405_v55 }
  0x27   : > { %814 = vmatprep.subr.msk.bf16.mxu1 %vm1067_vm1, %v812_v22  ;;  %v901_v60 = vld [vmem:[%s1058_s10 + $0x78] sm:$0xff]   ;;  %v842_v62 = vpack.c.bf16 %v424_v59, %v423_v58  ;;  %v407_v63 = vld [vmem:[%s1063_s13 + $0x70] sm:$0xff] }
  0x28   : > { %v408_v3 = vld [vmem:[%s1063_s13 + $0x78] sm:$0xff] }
  0x29   : > { %v902_v4 = vld [vmem:[%s1058_s10 + $0x38] sm:$0xff]   ;;  %v845_v5 = vpack.c.bf16 %v408_v3, %v407_v63 }
  0x2b   : > { %753 = vmatpush3.bf16.xpose.msra.mxu0 %v892_v23 }
  0x2c   : > { %754 = vmatprep.subr.bf16.mxu0 %v893_v28 }
  0x2e   : > { %817 = vmatpush3.bf16.xpose.msk.msra.mxu1 %vm1067_vm1, %v815_v29 }
  0x2f   : > { %820 = vmatprep.subr.msk.bf16.mxu1 %vm1067_vm1, %v818_v30 }
  0x33   : > { %755 = vmatpush3.bf16.xpose.msra.mxu0 %v894_v33 }
  0x34   : > { %756 = vmatprep.subr.bf16.mxu0 %v895_v36 }
  0x36   : > { %823 = vmatpush3.bf16.xpose.msk.msra.mxu1 %vm1067_vm1, %v821_v37 }
  0x37   : > { %826 = vmatprep.subr.msk.bf16.mxu1 %vm1067_vm1, %v824_v38 }
  0x3b   : > { %757 = vmatpush3.bf16.xpose.msra.mxu0 %v896_v41 }
  0x3c   : > { %758 = vmatprep.subr.bf16.mxu0 %v897_v44 }
  0x3e   : > { %829 = vmatpush3.bf16.xpose.msk.msra.mxu1 %vm1067_vm1, %v827_v45 }
  0x3f   : > { %832 = vmatprep.subr.msk.bf16.mxu1 %vm1067_vm1, %v830_v46 }
  0x43   : > { %759 = vmatpush3.bf16.xpose.msra.mxu0 %v898_v49 }
  0x44   : > { %760 = vmatprep.subr.bf16.mxu0 %v899_v52 }
  0x46   : > { %835 = vmatpush3.bf16.xpose.msk.msra.mxu1 %vm1067_vm1, %v833_v53 }
  0x47   : > { %838 = vmatprep.subr.msk.bf16.mxu1 %vm1067_vm1, %v836_v54 }
  0x4b   : > { %761 = vmatpush3.bf16.xpose.msra.mxu0 %v900_v57 }
  0x4c   : > { %762 = vmatprep.subr.bf16.mxu0 %v901_v60 }
  0x4e   : > { %841 = vmatpush3.bf16.xpose.msk.msra.mxu1 %vm1067_vm1, %v839_v61 }
  0x4f   : > { %844 = vmatprep.subr.msk.bf16.mxu1 %vm1067_vm1, %v842_v62 }
  0x53   : > { %763 = vmatpush3.bf16.xpose.msra.mxu0 %v902_v4 }
  0x56   : > { %847 = vmatpush3.bf16.xpose.msk.msra.mxu1 %vm1067_vm1, %v845_v5 }
  0x5a   : > { %765 = vmatmul.mubr.bf16.vlgmr.msra.gmra.mrb[0].mxu0 %v1045_v0 }
  0x5d   : > { %799 = vmatmul.mubr.msk.f32.vlgmr.msra.gmra.mrb[0].mxu1 %vm425_vm0, %v1050_v1 }
 0x12d   : > { %v385_v6 = vpop.f32.mrb[0].mxu0 }
 0x12e   : > { %v387_v7 = vpop.f32.mrb[1].mxu0 }
 0x12f   : > { %v389_v9 = vpop.f32.mrb[2].mxu0 }
 0x130   : > { %v591_v8 = vpop.f32.mrb[0].mxu1  ;;  %v390_v12 = vpop.f32.mrb[3].mxu0 }
 0x131   : > { %v592_v10 = vadd.f32 %v591_v8, %v385_v6  ;;  %v593_v11 = vpop.f32.mrb[1].mxu1 }
 0x132   : > { %v594_v2 = vadd.f32 %v593_v11, %v387_v7 }
 0x133   : > { %596 = vst [vmem:[%s207_s23] sm:$0xff] %v592_v10 }
 0x134   : > { %597 = vst [vmem:[%s207_s23 + $0x8] sm:$0xff] %v594_v2 }
 0x135   : > { %916 = shalt.err (!%p913_p3)
}
 0x136   : > { %s917_s9 = scalar_lea.hbm %s1159_s30, 256  ;;  %s921_s12 = scalar_lea.hbm %s1205_s4, 512 }
 0x137   : > { %p918_p4 = scmp.ne.s32.totalorder %s1159_s30, %s917_s9  ;;  %p922_p9 = scmp.lt.u32.totalorder %s1159_s30, %s1205_s4 }
 0x138   : > { %p923_p10 = scmp.lt.u32.totalorder %s921_s12, %s917_s9  ;;  %p925_p12 = scmp.lt.u32.totalorder %s917_s9, %s1159_s30 }
 0x139   : > { %p919_p7 = pnand %p918_p4, %p1031_p5 }
 0x13a   : > { %p924_p11 = por %p923_p10, %p922_p9 }
 0x13b   : > { %p920_p8 = pneg %p919_p7 }
 0x13c   : > { %p926_p13 = por %p925_p12, %p924_p11 }
 0x13e   : > { %p927_p0 = pnand %p926_p13, %p920_p8 }
 0x140   : > { %930 = shalt.err (!%p927_p0)
}
 0x141   : > { %848 = dma.vmem_to_hbm [thread:$0]  (%p1031_p5), %s1161_s27, 256, %s1159_s30, %s599_s19  }
 0x142 PF: > { %p854_p1 = scmp.ge.s32.totalorder %s965_s18, 2  ;;  %s625_s20 = sand.u32 1, %s953_s15  }
 0x143   : > { %s626_s22 = scalar_lea.sflag [#allocation3], %s625_s20 }
 0x144   : > { %p851_p2 = pnand %p854_p1, %p1035_p6 }
 0x146   : > { %948 = dma.done.wait (!%p851_p2), %s626_s22, 256  }
 0x147   : > { %950 = vsyncadd (!%p851_p2), %s626_s22, 4294967040  ;;  %p14_p3 = scmp.ge.s32.totalorder %s1018_s21, 4   ;;  %s1210_s15 = smov %s957_s16 }
 0x148   : > { %s1211_s16 = smov %s961_s17  ;;  %s1212_s17 = smov %s1029_s24 }
 0x149   : > { %s1213_s18 = smov %s1018_s21  ;;  %16 = sbr.rel (!%p14_p3) target bundleno = 3 (0x3), region = 74 }
 0x150   :  { %631 = vsyncpa [#allocation3], 1 }
 0x151   :  { %633 = vsyncpa [#allocation3 + $0x1], 1 }

</bundles_post_ra>
